<compile_context>
chip_gen: v5e
topology: v5e:2x2
jax: 0.10.0
libtpu: 0.0.40
codegen_flags: <defaults>
</compile_context>

<pallas_src>
import functools
import math

import jax
import jax.numpy as jnp
from jax.experimental import pallas as pl
from jax.experimental.pallas import tpu as pltpu


def _softplus_f32(z):
    # Numerically stable softplus, matches torch.nn.Softplus (beta=1).
    return jnp.maximum(z, 0.0) + jnp.log1p(jnp.exp(-jnp.abs(z)))


def _round_up(x, m):
    return ((x + m - 1) // m) * m


def _default_tanh_in_bf16():
    """bf16 tanh on v6e/v7x (bf16 EUP); f32 on v5e/v5p (no bf16 elementwise)."""
    try:
        kind = jax.devices()[0].device_kind.lower()
    except Exception:
        return True
    return "v5" not in kind


def _beta_policy_kernel(obs_ref,
                        w1_ref, b1_ref,
                        w2_ref, b2_ref,
                        wh_ref, bh_ref,
                        out_ref, *, tanh_in_bf16):
    """One batch tile of the fused MLP: 3 MXU matmuls + tanh/softplus.

    obs_ref / out_ref are (TB, .) tiles that advance with the grid; weight /
    bias refs always map to block (0, 0) so they remain VMEM-resident across
    grid steps.  obs arrives in f32 and is cast to bf16 in-vreg; matmuls
    accumulate in f32; softplus is always f32; tanh dtype is generation
    dependent (static flag).
    """
    w1 = w1_ref[...]
    mm_dtype = w1.dtype                                    # bf16 (from prepare_params)
    obs = obs_ref[...].astype(mm_dtype)                    # f32 DMA -> bf16 in-vreg

    z1 = jnp.dot(obs, w1, preferred_element_type=jnp.float32) + b1_ref[...]
    h1 = jnp.tanh(z1.astype(mm_dtype)) if tanh_in_bf16 else jnp.tanh(z1).astype(mm_dtype)

    z2 = jnp.dot(h1, w2_ref[...], preferred_element_type=jnp.float32) + b2_ref[...]
    h2 = jnp.tanh(z2.astype(mm_dtype)) if tanh_in_bf16 else jnp.tanh(z2).astype(mm_dtype)

    z = jnp.dot(h2, wh_ref[...], preferred_element_type=jnp.float32) + bh_ref[...]
    out_ref[...] = 1.0 + _softplus_f32(z)                  # f32 (TB, 2*A)


def prepare_params(params, mm_dtype=jnp.bfloat16):
    """Hoisted, call-once prep: fuse the two heads and cast weights to bf16.

    Call this once per parameter update (NOT per forward step); the returned
    tuple is what beta_policy_forward consumes.
    """
    w1, b1, w2, b2, wa, ba, wb, bb = params
    wh = jnp.concatenate([wa, wb], axis=1)                 # (h2, 2*A)
    bh = jnp.concatenate([ba, bb], axis=1)                 # (1, 2*A)
    return (w1.astype(mm_dtype), b1.astype(jnp.float32),
            w2.astype(mm_dtype), b2.astype(jnp.float32),
            wh.astype(mm_dtype), bh.astype(jnp.float32))


def beta_policy_forward(obs, prepared, *, block_b=4096, tanh_in_bf16=None):
    """Fused Pallas forward. obs: (B, obs_dim) float32, prepared from prepare_params.

    Returns (alpha, beta), each (B, action_dim) float32.
    """
    w1, b1, w2, b2, wh, bh = prepared
    B, obs_dim = obs.shape
    h1 = w1.shape[1]
    h2 = w2.shape[1]
    head_dim = wh.shape[1]
    action_dim = head_dim // 2

    if tanh_in_bf16 is None:
        tanh_in_bf16 = _default_tanh_in_bf16()

    # Batch tile: as large as requested (sweep 2048-8192), multiple of 8
    # sublanes.  Cap so the grid keeps >= 2 steps when the batch allows it,
    # letting ("parallel",) shard tiles across v7x's two TensorCores.
    tb = _round_up(min(block_b, _round_up(B, 8)), 8)
    if B >= 16:
        tb = min(tb, _round_up(pl.cdiv(B, 2), 8))
    grid = (pl.cdiv(B, tb),)   # ragged last block handled by Pallas (no jnp.pad)

    # Advisory cost estimate so XLA schedules surrounding PPO ops sensibly.
    w_bytes = (obs_dim * h1 + h1 * h2 + h2 * head_dim) * 2   # bf16 weights
    flops = 2 * B * (obs_dim * h1 + h1 * h2 + h2 * head_dim)
    transcendentals = B * (h1 + h2 + 2 * head_dim)           # tanh + exp/log1p
    bytes_accessed = (B * obs_dim * 4                         # f32 obs in
                      + w_bytes
                      + (h1 + h2 + head_dim) * 4              # f32 biases
                      + B * head_dim * 4)                     # fused f32 out

    # Rough VMEM budget: double-buffered obs/out tiles + resident weights +
    # in-kernel activation temporaries.  Only set an explicit limit when a
    # very large tb would exceed the 32 MiB scoped default (v7x-safe).
    vmem_est = (2 * tb * obs_dim * 4 + 2 * tb * head_dim * 4
                + 2 * w_bytes + 2 * (h1 + h2 + head_dim) * 4
                + tb * (h1 + h2) * 6 + tb * head_dim * 4)
    cp_kwargs = dict(dimension_semantics=("parallel",))
    if vmem_est > 30 * 1024 * 1024:
        cp_kwargs["vmem_limit_bytes"] = min(int(vmem_est * 3 // 2), 64 * 1024 * 1024)

    kernel = functools.partial(_beta_policy_kernel, tanh_in_bf16=tanh_in_bf16)

    out = pl.pallas_call(
        kernel,
        out_shape=jax.ShapeDtypeStruct((B, head_dim), jnp.float32),
        grid=grid,
        in_specs=[
            pl.BlockSpec((tb, obs_dim), lambda i: (i, 0)),       # f32 obs tile
            pl.BlockSpec((obs_dim, h1), lambda i: (0, 0)),       # W1 resident
            pl.BlockSpec((1, h1), lambda i: (0, 0)),             # b1
            pl.BlockSpec((h1, h2), lambda i: (0, 0)),            # W2 resident
            pl.BlockSpec((1, h2), lambda i: (0, 0)),             # b2
            pl.BlockSpec((h2, head_dim), lambda i: (0, 0)),      # W_head resident
            pl.BlockSpec((1, head_dim), lambda i: (0, 0)),       # b_head
        ],
        out_specs=pl.BlockSpec((tb, head_dim), lambda i: (i, 0)),
        compiler_params=pltpu.CompilerParams(**cp_kwargs),
        cost_estimate=pl.CostEstimate(
            flops=flops,
            transcendentals=transcendentals,
            bytes_accessed=bytes_accessed),
    )(obs, w1, b1, w2, b2, wh, bh)

    alpha = out[:, :action_dim]
    beta = out[:, action_dim:]
    return alpha, beta


def init_params(key, obs_dim, h1, h2, action_dim):
    """Deterministic init mimicking torch.nn.Linear default (U(-k, k), k=1/sqrt(fan_in))."""
    def linear(key, fan_in, fan_out):
        kw, kb = jax.random.split(key)
        bound = 1.0 / math.sqrt(fan_in)
        w = jax.random.uniform(kw, (fan_in, fan_out), jnp.float32, -bound, bound)
        b = jax.random.uniform(kb, (1, fan_out), jnp.float32, -bound, bound)
        return w, b

    k1, k2, k3, k4 = jax.random.split(key, 4)
    w1, b1 = linear(k1, obs_dim, h1)
    w2, b2 = linear(k2, h1, h2)
    wa, ba = linear(k3, h2, action_dim)
    wb, bb = linear(k4, h2, action_dim)
    return (w1, b1, w2, b2, wa, ba, wb, bb)


def reference_forward(obs, params):
    """Pure-JAX f32 reference for correctness check."""
    w1, b1, w2, b2, wa, ba, wb, bb = params
    x = jnp.tanh(obs @ w1 + b1)
    x = jnp.tanh(x @ w2 + b2)
    alpha = 1.0 + jax.nn.softplus(x @ wa + ba)
    beta = 1.0 + jax.nn.softplus(x @ wb + bb)
    return alpha, beta


if __name__ == "__main__":
    # Small, forward-consistent shapes (module defaults: hidden=64, action_dim=2).
    batch = 40          # deliberately NOT tile-aligned: exercises the ragged last block
    obs_dim = 32
    hidden1 = 64
    hidden2 = 64
    action_dim = 2

    key = jax.random.PRNGKey(0)
    k_obs, k_params = jax.random.split(key)

    obs = jax.random.normal(k_obs, (batch, obs_dim), dtype=jnp.float32)
    params = init_params(k_params, obs_dim, hidden1, hidden2, action_dim)

    # Head fusion / weight casts hoisted out of the per-step forward.
    prepared = prepare_params(params)

    # Small block_b so the demo exercises a multi-step batch grid + ragged tail.
    alpha, beta = beta_policy_forward(obs, prepared, block_b=16)
    jax.block_until_ready((alpha, beta))

    # Sanity-check against the pure-JAX f32 reference. Tolerance is relaxed
    # because the kernel uses bf16 matmul inputs (and bf16 tanh on v6e/v7x)
    # with f32 accumulation.
    alpha_ref, beta_ref = reference_forward(obs, params)
    assert alpha.shape == (batch, action_dim) and beta.shape == (batch, action_dim)
    assert jnp.allclose(alpha, alpha_ref, atol=3e-2, rtol=3e-2)
    assert jnp.allclose(beta, beta_ref, atol=3e-2, rtol=3e-2)
    # 1 + softplus(z) >= 1 always (softplus can underflow to exactly 0).
    assert bool(jnp.all(alpha >= 1.0)) and bool(jnp.all(beta >= 1.0))
    assert bool(jnp.all(jnp.isfinite(alpha))) and bool(jnp.all(jnp.isfinite(beta)))

    print("KERNEL_OK")
</pallas_src>

<mosaic_0001>
module attributes {stable_mosaic.version = 11 : i64} {
  func.func @_beta_policy_kernel(%arg0: i32, %arg1: memref<16x32xf32, #tpu.memory_space<vmem>>, %arg2: memref<32x64xbf16, #tpu.memory_space<vmem>>, %arg3: memref<1x64xf32, #tpu.memory_space<vmem>>, %arg4: memref<64x64xbf16, #tpu.memory_space<vmem>>, %arg5: memref<1x64xf32, #tpu.memory_space<vmem>>, %arg6: memref<64x4xbf16, #tpu.memory_space<vmem>>, %arg7: memref<1x4xf32, #tpu.memory_space<vmem>>, %arg8: memref<16x4xf32, #tpu.memory_space<vmem>>) attributes {dimension_semantics = [#tpu.dimension_semantics<parallel>], iteration_bounds = array<i64: 3>, scalar_prefetch = 0 : i64, scratch_operands = 0 : i64, tpu.core_type = #tpu.core_type<tc>, window_params = [{transform_indices = @transform_0, window_bounds = array<i64: 16, 32>}, {pipeline_mode = #tpu.pipeline_mode<synchronous>, transform_indices = @transform_1, window_bounds = array<i64: 32, 64>}, {pipeline_mode = #tpu.pipeline_mode<synchronous>, transform_indices = @transform_2, window_bounds = array<i64: 1, 64>}, {pipeline_mode = #tpu.pipeline_mode<synchronous>, transform_indices = @transform_3, window_bounds = array<i64: 64, 64>}, {pipeline_mode = #tpu.pipeline_mode<synchronous>, transform_indices = @transform_4, window_bounds = array<i64: 1, 64>}, {pipeline_mode = #tpu.pipeline_mode<synchronous>, transform_indices = @transform_5, window_bounds = array<i64: 64, 4>}, {pipeline_mode = #tpu.pipeline_mode<synchronous>, transform_indices = @transform_6, window_bounds = array<i64: 1, 4>}, {transform_indices = @transform_7, window_bounds = array<i64: 16, 4>}]} {
    %c0 = arith.constant 0 : index
    %c0_0 = arith.constant 0 : index
    %0 = vector.load %arg2[%c0, %c0_0] : memref<32x64xbf16, #tpu.memory_space<vmem>>, vector<32x64xbf16>
    %c0_1 = arith.constant 0 : index
    %c0_2 = arith.constant 0 : index
    %1 = vector.load %arg1[%c0_1, %c0_2] : memref<16x32xf32, #tpu.memory_space<vmem>>, vector<16x32xf32>
    %2 = arith.truncf %1 : vector<16x32xf32> to vector<16x32xbf16>
    %cst = arith.constant dense<0.000000e+00> : vector<16x64xf32>
    %3 = tpu.matmul %2, %0, %cst {dimension_numbers = #tpu.dot_dimension_numbers<[1], [0], [0], [1], [0, 0, 1, 1], [], []>} : vector<16x32xbf16>, vector<32x64xbf16>, vector<16x64xf32> -> vector<16x64xf32>
    %c0_3 = arith.constant 0 : index
    %c0_4 = arith.constant 0 : index
    %4 = vector.load %arg3[%c0_3, %c0_4] : memref<1x64xf32, #tpu.memory_space<vmem>>, vector<1x64xf32>
    %5 = vector.broadcast %4 : vector<1x64xf32> to vector<16x64xf32>
    %6 = arith.addf %3, %5 : vector<16x64xf32>
    %7 = arith.truncf %6 : vector<16x64xf32> to vector<16x64xbf16>
    %8 = math.tanh %7 : vector<16x64xbf16>
    %c0_5 = arith.constant 0 : index
    %c0_6 = arith.constant 0 : index
    %9 = vector.load %arg4[%c0_5, %c0_6] : memref<64x64xbf16, #tpu.memory_space<vmem>>, vector<64x64xbf16>
    %cst_7 = arith.constant dense<0.000000e+00> : vector<16x64xf32>
    %10 = tpu.matmul %8, %9, %cst_7 {dimension_numbers = #tpu.dot_dimension_numbers<[1], [0], [0], [1], [0, 0, 1, 1], [], []>} : vector<16x64xbf16>, vector<64x64xbf16>, vector<16x64xf32> -> vector<16x64xf32>
    %c0_8 = arith.constant 0 : index
    %c0_9 = arith.constant 0 : index
    %11 = vector.load %arg5[%c0_8, %c0_9] : memref<1x64xf32, #tpu.memory_space<vmem>>, vector<1x64xf32>
    %12 = vector.broadcast %11 : vector<1x64xf32> to vector<16x64xf32>
    %13 = arith.addf %10, %12 : vector<16x64xf32>
    %14 = arith.truncf %13 : vector<16x64xf32> to vector<16x64xbf16>
    %15 = math.tanh %14 : vector<16x64xbf16>
    %c0_10 = arith.constant 0 : index
    %c0_11 = arith.constant 0 : index
    %16 = vector.load %arg6[%c0_10, %c0_11] : memref<64x4xbf16, #tpu.memory_space<vmem>>, vector<64x4xbf16>
    %cst_12 = arith.constant dense<0.000000e+00> : vector<16x4xf32>
    %17 = tpu.matmul %15, %16, %cst_12 {dimension_numbers = #tpu.dot_dimension_numbers<[1], [0], [0], [1], [0, 0, 1, 1], [], []>} : vector<16x64xbf16>, vector<64x4xbf16>, vector<16x4xf32> -> vector<16x4xf32>
    %c0_13 = arith.constant 0 : index
    %c0_14 = arith.constant 0 : index
    %18 = vector.load %arg7[%c0_13, %c0_14] : memref<1x4xf32, #tpu.memory_space<vmem>>, vector<1x4xf32>
    %19 = vector.broadcast %18 : vector<1x4xf32> to vector<16x4xf32>
    %20 = arith.addf %17, %19 : vector<16x4xf32>
    %cst_15 = arith.constant 0.000000e+00 : f32
    %21 = vector.broadcast %cst_15 : f32 to vector<16x4xf32>
    %22 = arith.maximumf %20, %21 : vector<16x4xf32>
    %23 = math.absf %20 : vector<16x4xf32>
    %cst_16 = arith.constant 0.000000e+00 : f32
    %24 = vector.broadcast %cst_16 : f32 to vector<16x4xf32>
    %25 = arith.subf %24, %23 : vector<16x4xf32>
    %26 = math.exp %25 : vector<16x4xf32>
    %27 = math.log1p %26 : vector<16x4xf32>
    %28 = arith.addf %22, %27 : vector<16x4xf32>
    %cst_17 = arith.constant 1.000000e+00 : f32
    %29 = vector.broadcast %cst_17 : f32 to vector<16x4xf32>
    %30 = arith.addf %29, %28 : vector<16x4xf32>
    %c0_18 = arith.constant 0 : index
    %c0_19 = arith.constant 0 : index
    %31 = vector.load %arg8[%c0_18, %c0_19] : memref<16x4xf32, #tpu.memory_space<vmem>>, vector<16x4xf32>
    tpu.vector_store %arg8[%c0_18, %c0_19], %30 {strides = array<i32>} : memref<16x4xf32, #tpu.memory_space<vmem>>, vector<16x4xf32>,
    return
  }
  func.func @transform_0(%arg0: i32) -> (i32, i32) {
    %c0_i32 = arith.constant 0 : i32
    %c0_i32_0 = arith.constant 0 : i32
    return %arg0, %c0_i32 : i32, i32
  }
  func.func @transform_1(%arg0: i32) -> (i32, i32) {
    %c0_i32 = arith.constant 0 : i32
    %c0_i32_0 = arith.constant 0 : i32
    %c0_i32_1 = arith.constant 0 : i32
    return %c0_i32, %c0_i32_0 : i32, i32
  }
  func.func @transform_2(%arg0: i32) -> (i32, i32) {
    %c0_i32 = arith.constant 0 : i32
    %c0_i32_0 = arith.constant 0 : i32
    %c0_i32_1 = arith.constant 0 : i32
    return %c0_i32, %c0_i32_0 : i32, i32
  }
  func.func @transform_3(%arg0: i32) -> (i32, i32) {
    %c0_i32 = arith.constant 0 : i32
    %c0_i32_0 = arith.constant 0 : i32
    %c0_i32_1 = arith.constant 0 : i32
    return %c0_i32, %c0_i32_0 : i32, i32
  }
  func.func @transform_4(%arg0: i32) -> (i32, i32) {
    %c0_i32 = arith.constant 0 : i32
    %c0_i32_0 = arith.constant 0 : i32
    %c0_i32_1 = arith.constant 0 : i32
    return %c0_i32, %c0_i32_0 : i32, i32
  }
  func.func @transform_5(%arg0: i32) -> (i32, i32) {
    %c0_i32 = arith.constant 0 : i32
    %c0_i32_0 = arith.constant 0 : i32
    %c0_i32_1 = arith.constant 0 : i32
    return %c0_i32, %c0_i32_0 : i32, i32
  }
  func.func @transform_6(%arg0: i32) -> (i32, i32) {
    %c0_i32 = arith.constant 0 : i32
    %c0_i32_0 = arith.constant 0 : i32
    %c0_i32_1 = arith.constant 0 : i32
    return %c0_i32, %c0_i32_0 : i32, i32
  }
  func.func @transform_7(%arg0: i32) -> (i32, i32) {
    %c0_i32 = arith.constant 0 : i32
    %c0_i32_0 = arith.constant 0 : i32
    return %arg0, %c0_i32 : i32, i32
  }
}

</mosaic_0001>

<bundles_post_ra>
// kernel: tpu_custom_call.1
= control target key start
LH: loop header
LB: loop body
LE: loop exit
PB: predicated region body
PF: predicated region fallthrough
CT: control target
= control target key end

     0   :  { %s1031_s24 = smov 0   ;;  %s1033_s25 = smov 0   ;;  %s1155_s0 = inlined_call_operand.vmem [shape: f32[40,32], index: 0, kind: input, shape index: {}]   ;;  %s1156_s1 = inlined_call_operand.vmem [shape: bf16[32,64], index: 1, kind: input, shape index: {}]   ;;  %s1157_s2 = inlined_call_operand.vmem [shape: f32[1,64], index: 2, kind: input, shape index: {}]   ;;  %s1158_s3 = inlined_call_operand.vmem [shape: bf16[64,64], index: 3, kind: input, shape index: {}]   ;;  %s1159_s4 = inlined_call_operand.vmem [shape: f32[1,64], index: 4, kind: input, shape index: {}]   ;;  %s1160_s5 = inlined_call_operand.vmem [shape: bf16[64,4], index: 5, kind: input, shape index: {}]   ;;  %s1161_s6 = inlined_call_operand.vmem [shape: f32[1,4], index: 6, kind: input, shape index: {}]   ;;  %s1162_s7 = inlined_call_operand.vmem [shape: f32[40,4], index: 7, kind: output, shape index: {}]  }
   0x1   :  { %s1035_s26 = smov 0  }
   0x2 LB: > { %s1044_s27 = sadd.s32 4294967295, %s957_s26   ;;  %s1046_s28 = sadd.s32 1, %s957_s26   ;;  %s957_s26 = sphi %s1035_s26, %s1166_s26   ;;  %s953_s25 = sphi %s1033_s25, %s1165_s25   ;;  %s949_s24 = sphi %s1031_s24, %s1164_s24  }
   0x3   : > { %s173_s29 = ssub.s32 %s957_s26, %s1046_s28  ;;  %s176_s30 = sadd.s32 1, %s953_s25 }
   0x4   : > { %p174_p0 = scmp.eq.s32.totalorder %s173_s29, 0  ;;  %p186_p1 = scmp.ne.s32.totalorder %s953_s25, %s949_s24 }
   0x5   : > { %p187_p2 = scmp.eq.s32.totalorder %s1044_s27, 2  ;;  %p719_p3 = scmp.ge.s32.totalorder %s957_s26, 1 }
   0x6   : > { %s1054_s8 = scalar_select %p174_p0, %s953_s25, %s176_s30  }
   0x7   : > { %p1056_p4 = por %p187_p2, %p186_p1  ;;  %p246_p5 = scmp.lt.s32.totalorder %s957_s26, 4 }
   0x9   : > { %p247_p6 = pnand %p719_p3, %p246_p5 }
   0xa   : > { %s1064_s12 = sshll.u32 (!%p247_p6), %s1044_s27, 1  ;;  %s278_s30 = sand.u32 (!%p247_p6), 1, %s949_s24  }
   0xb   : > { %250 = sbr.rel (%p247_p6) target bundleno = 535 (0x217), region = 48  ;;  %p286_p7 = scmp.lt.s32.totalorder (!%p247_p6), %s1064_s12, 4 }
   0xc   : > { %s720_s10 = sshll.u32 (!%p247_p6), %s278_s30, 4 }
   0xd   : > { %s1110_s11 = scalar_lea.vmem (!%p247_p6), [#allocation2], %s720_s10  }
  0x10   : > { %v784_v0 = vld [vmem:[%s1156_s1 + $0x8] sm:$0xff]  ;;  %v783_v1 = vld [vmem:[%s1156_s1] sm:$0xff]  ;;  %s287_s15 = scalar_select %p286_p7, %s1064_s12, 4  ;;  %vm324_vm0 = vcmask 261120   ;;  %v788_v5 = vld [vmem:[%s1158_s3 + $0x18] sm:$0xff]  ;;  %vm384_vm1 = vcmask 523264  }
  0x11   : > { %334 = vmatpush.bf16.msra.mxu0 %v784_v0  ;;  %392 = vmatpush.bf16.msra.mxu1 %v788_v5  ;;  %v787_v6 = vld [vmem:[%s1158_s3 + $0x10] sm:$0xff]  ;;  %v786_v7 = vld [vmem:[%s1158_s3 + $0x8] sm:$0xff]  ;;  %v785_v8 = vld [vmem:[%s1158_s3] sm:$0xff]  ;;  %vm493_vm3 = vcmask 31744   ;;  %s504_s24 = ssub.s32 (%p1056_p4), 5, %s1064_s12  ;;  %s793_s13 = sshll.u32 (%p1056_p4), %s1044_s27, 4 }
  0x12   : > { %s722_s16 = sshll.u32 %s287_s15, 3  ;;  %v884_v10 = vld [vmem:[%s1157_s2] ss:$0 sm:$0xff]  ;;  %v792_v20 = vld [vmem:[%s1160_s5 + $0x18] sm:$0xff]  ;;  %v791_v21 = vld [vmem:[%s1160_s5 + $0x10] sm:$0xff]  ;;  %p505_p8 = scmp.lt.s32.totalorder (%p1056_p4), %s504_s24, 2 }
  0x13   : > { %s289_s19 = scalar_lea.vmem %s1155_s0, %s722_s16  ;;  %451 = vmatpush.bf16.msra.mxu2 %v792_v20  ;;  %v790_v22 = vld [vmem:[%s1160_s5 + $0x8] sm:$0xff]  ;;  %v789_v23 = vld [vmem:[%s1160_s5] sm:$0xff]  ;;  %s1121_s16 = scalar_lea.vmem (%p1056_p4), %s1162_s7, %s793_s13  }
  0x14   : > { %v305_v2 = vld [vmem:[%s289_s19] sm:$0xff]  ;;  %v306_v3 = vld [vmem:[%s289_s19 + $0x8] sm:$0xff] }
  0x15   : > { %335 = vmatpush.bf16.msra.mxu0 %v783_v1  ;;  %v307_v4 = vpack.c.bf16 %v306_v3, %v305_v2  ;;  %393 = vmatpush.bf16.msra.mxu1 %v787_v6  ;;  %v885_v25 = vld [vmem:[%s1159_s4] ss:$0 sm:$0xff] }
  0x16   : > { %v886_v35 = vld [vmem:[%s1161_s6] ss:$0 sm:$0xff] }
  0x17   : > { %452 = vmatpush.bf16.msra.mxu2 %v791_v21 }
  0x18   : > { %731 = vmatmul.msk.bf16.vlgmr.msra.gmra.mxu0 %vm324_vm0, %v307_v4 }
  0x19   : > { %394 = vmatpush.bf16.msra.mxu1 %v786_v7 }
  0x1b   : > { %453 = vmatpush.bf16.msra.mxu2 %v790_v22 }
  0x1d   : > { %395 = vmatpush.bf16.msra.mxu1 %v785_v8 }
  0x1f   : > { %454 = vmatpush.bf16.msra.mxu2 %v789_v23 }
  0x95   : > { %v337_v9 = vpop.f32.mrf.mxu0 }
  0x96   : > { %v338_v12 = vadd.f32 %v884_v10, %v337_v9 }
  0x9d   : > { %v339_v11 = vpop.f32.mrf.mxu0 }
  0x9e   : > { %v340_v13 = vadd.f32 %v884_v10, %v339_v11 }
  0xa0   : > { %v342_v14 = vpack.c.bf16 %v340_v13, %v338_v12 }
  0xa2   : > { %v343_v15 = vunpack.c.l.bf16 %v342_v14  ;;  %v344_v16 = vunpack.c.h.bf16 %v342_v14 }
  0xa4   : > { %887 = vtanh.f32 %v343_v15 }
  0xa5   : > { %889 = vtanh.f32 %v344_v16 }
  0xaa   : > { %v888_v17 = vpop.eup %887 }
  0xab   : > { %v890_v18 = vpop.eup %889 }
  0xac   : > { %v347_v19 = vpack.c.bf16 %v890_v18, %v888_v17 }
  0xae   : > { %748 = vmatmul.msk.bf16.vlgmr.msra.gmra.mxu1 %vm384_vm1, %v347_v19 }
 0x12b   : > { %v397_v24 = vpop.f32.mrf.mxu1 }
 0x12c   : > { %v398_v27 = vadd.f32 %v885_v25, %v397_v24 }
 0x133   : > { %v399_v26 = vpop.f32.mrf.mxu1 }
 0x134   : > { %v400_v28 = vadd.f32 %v885_v25, %v399_v26 }
 0x136   : > { %v402_v29 = vpack.c.bf16 %v400_v28, %v398_v27 }
 0x138   : > { %v403_v30 = vunpack.c.l.bf16 %v402_v29  ;;  %v404_v31 = vunpack.c.h.bf16 %v402_v29 }
 0x13a   : > { %891 = vtanh.f32 %v403_v30 }
 0x13b   : > { %893 = vtanh.f32 %v404_v31 }
 0x140   : > { %v892_v32 = vpop.eup %891 }
 0x141   : > { %v894_v33 = vpop.eup %893 }
 0x142   : > { %v407_v34 = vpack.c.bf16 %v894_v33, %v892_v32 }
 0x144   : > { %765 = vmatmul.msk.bf16.vlgmr.msra.gmra.mxu2 %vm384_vm1, %v407_v34 }
 0x1c7   : > { %v456_v36 = vpop.f32.mrf.mxu2 }
 0x1c8   : > { %v457_v37 = vadd.f32 %v886_v35, %v456_v36 }
 0x1ca   : > { %v463_v38 = vand.u32 2147483647, %v457_v37  ;;  %v461_v57 = vmax.f32 %v457_v37, 0.0 }
 0x1cc   : > { %v465_v39 = vsub.f32 0.0, %v463_v38 }
 0x1ce   : > { %v467_v40 = vmul.f32 1.442695, %v465_v39 }
 0x1cf   : > { %v458_v41 = vpop.f32.mrf.mxu2 }
 0x1d0   : > { %895 = vpow2.f32 %v467_v40  ;;  %v459_v42 = vadd.f32 %v886_v35, %v458_v41 }
 0x1d2   : > { %v464_v43 = vand.u32 2147483647, %v459_v42  ;;  %v462_v2 = vmax.f32 %v459_v42, 0.0 }
 0x1d4   : > { %v466_v44 = vsub.f32 0.0, %v464_v43 }
 0x1d6   : > { %v896_v45 = vpop.eup %895  ;;  %v469_v46 = vmul.f32 1.442695, %v466_v44 }
 0x1d7   : > { %v471_v47 = vadd.f32 1.0, %v896_v45  ;;  %v474_v48 = vmul.f32 -0.5, %v896_v45  ;;  %v477_v50 = vand.u32 2147483647, %v896_v45 }
 0x1d8   : > { %897 = vpow2.f32 %v469_v46 }
 0x1d9   : > { %899 = vlog2.f32 %v471_v47  ;;  %v475_v49 = vadd.f32 1.0, %v474_v48  ;;  %vm478_vm2 = vcmp.lt.f32.partialorder %v477_v50, 0.0004427343 }
 0x1db   : > { %v476_v55 = vmul.f32 %v896_v45, %v475_v49 }
 0x1de   : > { %v898_v51 = vpop.eup %897 }
 0x1df   : > { %v900_v52 = vpop.eup %899  ;;  %v480_v53 = vadd.f32 1.0, %v898_v51  ;;  %v483_v56 = vmul.f32 -0.5, %v898_v51  ;;  %v486_v62 = vand.u32 2147483647, %v898_v51 }
 0x1e0   : > { %v473_v54 = vmul.f32 0.6931472, %v900_v52 }
 0x1e1   : > { %901 = vlog2.f32 %v480_v53  ;;  %v484_v60 = vadd.f32 1.0, %v483_v56  ;;  %vm487_vm4 = vcmp.lt.f32.partialorder %v486_v62, 0.0004427343 }
 0x1e2   : > { %v479_v58 = vsel %vm478_vm2, %v476_v55, %v473_v54 }
 0x1e3   : > { %v489_v59 = vadd.f32 %v479_v58, %v461_v57  ;;  %v485_v1 = vmul.f32 %v898_v51, %v484_v60 }
 0x1e5   : > { %v491_v61 = vadd.f32 1.0, %v489_v59 }
 0x1e7   : > { %v902_v63 = vpop.eup %901  ;;  %494 = vst.msk [vmem:[%s1110_s11] sm:$0xff] %vm493_vm3, %v491_v61 }
 0x1e8   : > { %v482_v0 = vmul.f32 0.6931472, %v902_v63 }
 0x1ea   : > { %v488_v3 = vsel %vm487_vm4, %v485_v1, %v482_v0 }
 0x1eb   : > { %v490_v4 = vadd.f32 %v488_v3, %v462_v2  ;;  %502 = sbr.rel (!%p1056_p4) target bundleno = 535 (0x217), region = 52 }
 0x1ed   : > { %v492_v5 = vadd.f32 1.0, %v490_v4 }
 0x1ef   : > { %495 = vst.msk [vmem:[%s1110_s11 + $0x8] sm:$0xff] %vm493_vm3, %v492_v5 }
 0x1f0   : > { %s1168_s24 = smov (!%p505_p8, %s504_s24), 2 }
 0x1f1   : > { %s768_s17 = sshll.u32 %s1168_s24, 3 }
 0x1f2   : > { %p771_p9 = scmp.eq.s32.totalorder %s768_s17, 0 }
 0x1f3   : > { %s1127_s18 = sshrl.u32 (!%p771_p9), %s1168_s24, 1 }
 0x1f4   : > { %513 = sbr.rel (%p771_p9) target bundleno = 535 (0x217), region = 56  ;;  %p772_p10 = scmp.le.s32.totalorder (!%p771_p9), %s1127_s18, 0 }
 0x1f9   : > { %672 = sbr.rel (%p772_p10) target bundleno = 518 (0x206), region = 132  ;;  %s959_s27 = smov (!%p772_p10), %s1121_s16  }
 0x1fa   : > { %s963_s9 = smov (!%p772_p10), %s1110_s11   ;;  %s967_s12 = smov (!%p772_p10), 0  }
 0x1fb   : > { %s971_s19 = smov (!%p772_p10), 0  }
 0x1fe LB: >> { %v578_v6 = vld [vmem:[%s965_s9] sm:$0xff]  ;;  %v580_v7 = vld [vmem:[%s965_s9 + $0x8] sm:$0xff]  ;;  %s582_s20 = sadd.s32 1, %s969_s12  ;;  %s572_s19 = sadd.s32 1, %s973_s19   ;;  %s973_s19 = sphi %s971_s19, %s572_s19   ;;  %s969_s12 = sphi %s967_s12, %s968_s12   ;;  %s965_s9 = sphi %s963_s9, %s587_s9   ;;  %s961_s27 = sphi %s959_s27, %s588_s27  }
 0x1ff   : >> { %579 = vst [vmem:[%s961_s27] sm:$0xff] %v578_v6  ;;  %p583_p11 = scmp.ge.s32.totalorder %s582_s20, %s1127_s18  ;;  %p571_p12 = scmp.ge.s32.totalorder %s572_s19, %s1127_s18 }
 0x200   : >> { %581 = vst [vmem:[%s961_s27 + $0x8] sm:$0xff] %v580_v7 }
 0x201   : >> { %s1170_s20 = smov (%p583_p11, %s582_s20), 0  ;;  %574 = sbr.rel (!%p571_p12) target bundleno = 510 (0x1fe), region = 138 }
 0x202   : >> { %s773_s21 = sshll.u32 %s1170_s20, 4  ;;  %s968_s12 = smov %s1170_s20  }
 0x203   : >> { %s587_s9 = scalar_lea.vmem %s1110_s11, %s773_s21 [#allocation2]   ;;  %s588_s27 = scalar_lea.vmem %s1121_s16, %s773_s21  }
 0x206 PF: > { %s1137_s22 = sand.u32 1, %s1168_s24   ;;  %s794_s23 = sshll.u32 %s1127_s18, 4 }
 0x207   : > { %s593_s26 = scalar_lea.vmem %s1110_s11, %s794_s23 [#allocation2]   ;;  %s595_s29 = scalar_lea.vmem %s1121_s16, %s794_s23  }
 0x208   : > { %p778_p13 = scmp.le.s32.totalorder %s1137_s22, 0 }
 0x209   : > { %s975_s30 = smov (!%p778_p13), %s595_s29   ;;  %s979_s10 = smov (!%p778_p13), %s593_s26  }
 0x20a   : > { %686 = sbr.rel (%p778_p13) target bundleno = 535 (0x217), region = 143  ;;  %s983_s13 = smov (!%p778_p13), 0  }
 0x20b   : > { %s987_s14 = smov (!%p778_p13), 0  }
 0x20f LB: >> { %v605_v8 = vld [vmem:[%s981_s10] sm:$0xff]  ;;  %s607_s24 = sadd.s32 1, %s985_s13  ;;  %s599_s14 = sadd.s32 1, %s989_s14   ;;  %s989_s14 = sphi %s987_s14, %s599_s14   ;;  %s985_s13 = sphi %s983_s13, %s984_s13   ;;  %s981_s10 = sphi %s979_s10, %s612_s10   ;;  %s977_s30 = sphi %s975_s30, %s613_s30  }
 0x210   : >> { %606 = vst [vmem:[%s977_s30] sm:$0xff] %v605_v8  ;;  %p608_p0 = scmp.ge.s32.totalorder %s607_s24, %s1137_s22  ;;  %p598_p1 = scmp.ge.s32.totalorder %s599_s14, %s1137_s22 }
 0x212   : >> { %s1172_s24 = smov (%p608_p0, %s607_s24), 0  ;;  %601 = sbr.rel (!%p598_p1) target bundleno = 527 (0x20f), region = 149 }
 0x213   : >> { %s779_s11 = sshll.u32 %s1172_s24, 3  ;;  %s984_s13 = smov %s1172_s24  }
 0x214   : >> { %s612_s10 = scalar_lea.vmem %s593_s26, %s779_s11 [#allocation2]   ;;  %s613_s30 = scalar_lea.vmem %s595_s29, %s779_s11  }
 0x217 PF: > { %p14_p2 = scmp.ge.s32.totalorder %s1046_s28, 5   ;;  %s1164_s24 = smov %s953_s25 }
 0x218   : > { %s1165_s25 = smov %s1054_s8  ;;  %s1166_s26 = smov %s1046_s28 }
 0x219   :  { %16 = sbr.rel (!%p14_p2) target bundleno = 2 (0x2), region = 160 }

</bundles_post_ra>
